<compile_context>
chip_gen: v7x
topology: tpu7x:2x2x1
jax: 0.10.0
libtpu: 0.0.40
codegen_flags: <defaults>
</compile_context>

<pallas_src>
from functools import partial

import numpy as np

import jax
import jax.numpy as jnp
from jax import lax
from jax.experimental import pallas as pl
from jax.experimental.pallas import tpu as pltpu

EPS = 1e-5                    # torch.nn.GroupNorm default
MXU_DTYPE = jnp.bfloat16      # conv matmul operand dtype (f32 accumulation);
                              # set to jnp.float32 for bit-faithful f32 convs.


# --------------------------------- kernel ------------------------------------
def _make_resblock_kernel(W):
    """Kernel body; the image width W is closed over for static roll shifts."""

    def kernel(x_ref, masks_ref,
               gmix1_ref, g1_ref, b1_ref, w1_ref,
               gmix2_ref, g2_ref, b2_ref, w2_ref,
               o_ref):
        x = x_ref[0].astype(jnp.float32)          # (C, HW): channels x pixels (lane-dense)
        C, HW = x.shape
        masks = masks_ref[...]                    # (9*C, HW) 0/1 conv-tap masks

        def group_norm_relu(v, gmix_ref, gamma_ref, beta_ref):
            # v: (Cc, HW).  gmix is prescaled by 1/(group_size*HW), so the
            # group-averaged moments come out of two tiny matmuls with no
            # divides; the per-pixel path is a single FMA + ReLU.
            s = jnp.sum(v, axis=1, keepdims=True)                      # (Cc, 1) lane reduce
            s2 = jnp.sum(v * v, axis=1, keepdims=True)                 # (Cc, 1)
            gmean = jnp.dot(gmix_ref[...], s,
                            preferred_element_type=jnp.float32)        # E[x]   per group
            gmean2 = jnp.dot(gmix_ref[...], s2,
                             preferred_element_type=jnp.float32)       # E[x^2] per group
            var = jnp.maximum(gmean2 - gmean * gmean, 0.0)             # clamp cancellation
            inv = lax.rsqrt(var + EPS)
            scale = inv * gamma_ref[...]                               # (Cc, 1)
            shift = beta_ref[...] - gmean * scale                      # (Cc, 1)
            return jnp.maximum(v * scale + shift, 0.0)                 # one FMA + ReLU / pixel

        def conv3x3(v, wmat_ref):
            # v: (Cin, HW).  im2col via 9 static lane rotations; one tap-mask
            # multiply supplies the zero padding; one MXU matmul does the conv.
            pieces = []
            for dy in (-1, 0, 1):
                for dx in (-1, 0, 1):
                    off = dy * W + dx
                    pieces.append(v if off == 0
                                  else pltpu.roll(v, shift=(-off) % HW, axis=1))
            patches = jnp.concatenate(pieces, axis=0) * masks          # (9*Cin, HW)
            w = wmat_ref[...]                                          # (Cout, 9*Cin) bf16
            return jnp.dot(w, patches.astype(w.dtype),                 # single MXU push, K=9*Cin
                           preferred_element_type=jnp.float32)         # (Cout, HW) f32

        h = group_norm_relu(x, gmix1_ref, g1_ref, b1_ref)
        h = conv3x3(h, w1_ref)
        h = group_norm_relu(h, gmix2_ref, g2_ref, b2_ref)
        h = conv3x3(h, w2_ref)
        o_ref[0] = (h + x).astype(o_ref.dtype)                         # residual add

    return kernel


# ------------------------- wrapper-side layout plumbing -----------------------
def _group_mix(C, groups, HW):
    """(C, C) group-averaging matrix prescaled by 1/(group_size * H * W)."""
    gs = C // groups
    gidx = np.arange(C) // gs
    m = (gidx[:, None] == gidx[None, :]).astype(np.float32) / float(gs * HW)
    return jnp.asarray(m)


def _conv_tap_masks(H, W, cin):
    """(9*cin, H*W) 0/1 masks: tap (dy,dx) is valid iff the shifted pixel is in-image."""
    hh, ww = np.meshgrid(np.arange(H), np.arange(W), indexing="ij")
    rows = []
    for dy in (-1, 0, 1):
        for dx in (-1, 0, 1):
            rows.append(((hh + dy >= 0) & (hh + dy < H) &
                         (ww + dx >= 0) & (ww + dx < W)).reshape(-1))
    m9 = np.stack(rows).astype(np.float32)                  # (9, H*W)
    return jnp.asarray(np.repeat(m9, cin, axis=0))          # rows ordered k*cin + ci


def _conv_weight_matrix(w_hwio):
    """(3,3,Ci,Co) HWIO conv weight -> (Co, 9*Ci) im2col matrix in MXU dtype."""
    ci, co = w_hwio.shape[2], w_hwio.shape[3]
    return (jnp.transpose(w_hwio.reshape(9, ci, co), (2, 0, 1))
            .reshape(co, 9 * ci).astype(MXU_DTYPE))


@partial(jax.jit, static_argnames=("groups1", "groups2"))
def resblock_pallas(x_nchw, w1_hwio, gamma1, beta1, w2_hwio, gamma2, beta2,
                    *, groups1, groups2):
    """x_nchw: (N, C, H, W) float32 -> (N, C, H, W) float32."""
    N, C, H, W = x_nchw.shape
    HW = H * W
    planes = w1_hwio.shape[3]
    assert planes == C == w2_hwio.shape[2] == w2_hwio.shape[3], \
        "stride=1 / no-downsample block requires inplanes == planes"
    assert C % groups1 == 0 and planes % groups2 == 0, "GroupNorm needs C % groups == 0"
    assert HW % 128 == 0, "lane-dense layout wants H*W to be a multiple of 128"

    # Reshape-only plumbing (no NCHW<->NHWC transpose round-trips).
    x = x_nchw.reshape(N, C, HW)

    gmix1 = _group_mix(C, groups1, HW)
    gmix2 = _group_mix(planes, groups2, HW)
    wmat1 = _conv_weight_matrix(w1_hwio)
    wmat2 = _conv_weight_matrix(w2_hwio)
    masks = _conv_tap_masks(H, W, C)
    g1 = gamma1.reshape(C, 1).astype(jnp.float32)
    b1 = beta1.reshape(C, 1).astype(jnp.float32)
    g2 = gamma2.reshape(planes, 1).astype(jnp.float32)
    b2 = beta2.reshape(planes, 1).astype(jnp.float32)

    def param(a):                 # full (untiled) 2-D parameter block
        return pl.BlockSpec(a.shape, lambda n: (0, 0))

    out = pl.pallas_call(
        _make_resblock_kernel(W),
        out_shape=jax.ShapeDtypeStruct((N, C, HW), x_nchw.dtype),
        grid_spec=pltpu.PrefetchScalarGridSpec(
            num_scalar_prefetch=0,
            grid=(N,),                                        # one batch element per step
            in_specs=[
                pl.BlockSpec((1, C, HW), lambda n: (n, 0, 0)),  # x, lane-dense (HW lanes)
                param(masks),
                param(gmix1), param(g1), param(b1), param(wmat1),
                param(gmix2), param(g2), param(b2), param(wmat2),
            ],
            out_specs=pl.BlockSpec((1, C, HW), lambda n: (n, 0, 0)),
        ),
        compiler_params=pltpu.CompilerParams(
            dimension_semantics=("parallel",)),               # megacore split on v7x
    )(x, masks, gmix1, g1, b1, wmat1, gmix2, g2, b2, wmat2)

    return out.reshape(N, C, H, W)


# ---------------------- pure-JAX reference (for verification) -----------------
def _groupnorm_ref(x_nhwc, gamma, beta, groups, eps=EPS):
    N, H, W, C = x_nhwc.shape
    gs = C // groups
    xr = x_nhwc.reshape(N, H, W, groups, gs)
    mean = xr.mean(axis=(1, 2, 4), keepdims=True)
    var = ((xr - mean) ** 2).mean(axis=(1, 2, 4), keepdims=True)
    y = ((xr - mean) / jnp.sqrt(var + eps)).reshape(N, H, W, C)
    return y * gamma.reshape(1, 1, 1, C) + beta.reshape(1, 1, 1, C)


def _conv3x3_ref(x_nhwc, w_hwio):
    # Same bf16-operand / f32-accumulation contract as the kernel's MXU matmul.
    return lax.conv_general_dilated(
        x_nhwc.astype(MXU_DTYPE), w_hwio.astype(MXU_DTYPE),
        window_strides=(1, 1), padding="SAME",
        dimension_numbers=("NHWC", "HWIO", "NHWC"),
        preferred_element_type=jnp.float32)


def resblock_ref(x_nchw, w1, g1, b1, groups1, w2, g2, b2, groups2):
    x = jnp.transpose(x_nchw, (0, 2, 3, 1))
    out = jax.nn.relu(_groupnorm_ref(x, g1, b1, groups1))
    out = _conv3x3_ref(out, w1)
    out = jax.nn.relu(_groupnorm_ref(out, g2, b2, groups2))
    out = _conv3x3_ref(out, w2)
    return jnp.transpose(out + x, (0, 3, 1, 2))


# ------------------------------------ main ------------------------------------
if __name__ == "__main__":
    N, C, H, W = 2, 4, 16, 16          # inplanes = planes = 4, stride = 1
    planes = C
    groups1 = min(32, C)
    groups2 = min(32, planes)

    key = jax.random.PRNGKey(0)
    k = iter(jax.random.split(key, 8))

    x = jax.random.normal(next(k), (N, C, H, W), jnp.float32)          # NCHW like PyTorch

    # Deterministic synthetic parameters (shapes match nn.Conv2d / nn.GroupNorm).
    w1 = 0.1 * jax.random.normal(next(k), (3, 3, C, planes), jnp.float32)       # HWIO
    w2 = 0.1 * jax.random.normal(next(k), (3, 3, planes, planes), jnp.float32)
    g1 = 1.0 + 0.1 * jax.random.normal(next(k), (C,), jnp.float32)
    b1 = 0.1 * jax.random.normal(next(k), (C,), jnp.float32)
    g2 = 1.0 + 0.1 * jax.random.normal(next(k), (planes,), jnp.float32)
    b2 = 0.1 * jax.random.normal(next(k), (planes,), jnp.float32)

    out = resblock_pallas(x, w1, g1, b1, w2, g2, b2, groups1=groups1, groups2=groups2)
    out = jax.block_until_ready(out)

    ref = jax.block_until_ready(
        resblock_ref(x, w1, g1, b1, groups1, w2, g2, b2, groups2))

    assert out.shape == (N, C, H, W)
    # Both paths use bf16 conv operands with f32 accumulation; residual diffs
    # come only from accumulation order / variance formulation (<< 1e-2).
    np.testing.assert_allclose(np.asarray(out), np.asarray(ref), atol=1e-2, rtol=1e-2)

    print("KERNEL_OK")
</pallas_src>

<mosaic_0001>
module attributes {stable_mosaic.version = 11 : i64} {
  func.func @kernel(%arg0: i32, %arg1: memref<1x4x256xf32, #tpu.memory_space<vmem>>, %arg2: memref<36x256xf32, #tpu.memory_space<vmem>>, %arg3: memref<4x4xf32, #tpu.memory_space<vmem>>, %arg4: memref<4x1xf32, #tpu.memory_space<vmem>>, %arg5: memref<4x1xf32, #tpu.memory_space<vmem>>, %arg6: memref<4x36xbf16, #tpu.memory_space<vmem>>, %arg7: memref<4x4xf32, #tpu.memory_space<vmem>>, %arg8: memref<4x1xf32, #tpu.memory_space<vmem>>, %arg9: memref<4x1xf32, #tpu.memory_space<vmem>>, %arg10: memref<4x36xbf16, #tpu.memory_space<vmem>>, %arg11: memref<1x4x256xf32, #tpu.memory_space<vmem>>) attributes {dimension_semantics = [#tpu.dimension_semantics<parallel>], iteration_bounds = array<i64: 2>, scalar_prefetch = 0 : i64, scratch_operands = 0 : i64, tpu.core_type = #tpu.core_type<tc>, window_params = [{transform_indices = @transform_0, window_bounds = array<i64: 1, 4, 256>}, {pipeline_mode = #tpu.pipeline_mode<synchronous>, transform_indices = @transform_1, window_bounds = array<i64: 36, 256>}, {pipeline_mode = #tpu.pipeline_mode<synchronous>, transform_indices = @transform_2, window_bounds = array<i64: 4, 4>}, {pipeline_mode = #tpu.pipeline_mode<synchronous>, transform_indices = @transform_3, window_bounds = array<i64: 4, 1>}, {pipeline_mode = #tpu.pipeline_mode<synchronous>, transform_indices = @transform_4, window_bounds = array<i64: 4, 1>}, {pipeline_mode = #tpu.pipeline_mode<synchronous>, transform_indices = @transform_5, window_bounds = array<i64: 4, 36>}, {pipeline_mode = #tpu.pipeline_mode<synchronous>, transform_indices = @transform_6, window_bounds = array<i64: 4, 4>}, {pipeline_mode = #tpu.pipeline_mode<synchronous>, transform_indices = @transform_7, window_bounds = array<i64: 4, 1>}, {pipeline_mode = #tpu.pipeline_mode<synchronous>, transform_indices = @transform_8, window_bounds = array<i64: 4, 1>}, {pipeline_mode = #tpu.pipeline_mode<synchronous>, transform_indices = @transform_9, window_bounds = array<i64: 4, 36>}, {transform_indices = @transform_10, window_bounds = array<i64: 1, 4, 256>}]} {
    %c0 = arith.constant 0 : index
    %c0_0 = arith.constant 0 : index
    %c0_1 = arith.constant 0 : index
    %0 = vector.load %arg1[%c0, %c0_0, %c0_1] : memref<1x4x256xf32, #tpu.memory_space<vmem>>, vector<1x4x256xf32>
    %1 = vector.shape_cast %0 : vector<1x4x256xf32> to vector<4x256xf32>
    %c0_2 = arith.constant 0 : index
    %c0_3 = arith.constant 0 : index
    %2 = vector.load %arg2[%c0_2, %c0_3] : memref<36x256xf32, #tpu.memory_space<vmem>>, vector<36x256xf32>
    %cst = arith.constant dense<0.000000e+00> : vector<4xf32>
    %3 = vector.multi_reduction <add>, %1, %cst [1] : vector<4x256xf32> to vector<4xf32>
    %4 = vector.shape_cast %3 : vector<4xf32> to vector<4x1xf32>
    %5 = arith.mulf %1, %1 : vector<4x256xf32>
    %cst_4 = arith.constant dense<0.000000e+00> : vector<4xf32>
    %6 = vector.multi_reduction <add>, %5, %cst_4 [1] : vector<4x256xf32> to vector<4xf32>
    %7 = vector.shape_cast %6 : vector<4xf32> to vector<4x1xf32>
    %c0_5 = arith.constant 0 : index
    %c0_6 = arith.constant 0 : index
    %8 = vector.load %arg3[%c0_5, %c0_6] : memref<4x4xf32, #tpu.memory_space<vmem>>, vector<4x4xf32>
    %cst_7 = arith.constant dense<0.000000e+00> : vector<4x1xf32>
    %9 = tpu.matmul %8, %4, %cst_7 {dimension_numbers = #tpu.dot_dimension_numbers<[1], [0], [0], [1], [0, 0, 1, 1], [], []>} : vector<4x4xf32>, vector<4x1xf32>, vector<4x1xf32> -> vector<4x1xf32>
    %c0_8 = arith.constant 0 : index
    %c0_9 = arith.constant 0 : index
    %10 = vector.load %arg3[%c0_8, %c0_9] : memref<4x4xf32, #tpu.memory_space<vmem>>, vector<4x4xf32>
    %cst_10 = arith.constant dense<0.000000e+00> : vector<4x1xf32>
    %11 = tpu.matmul %10, %7, %cst_10 {dimension_numbers = #tpu.dot_dimension_numbers<[1], [0], [0], [1], [0, 0, 1, 1], [], []>} : vector<4x4xf32>, vector<4x1xf32>, vector<4x1xf32> -> vector<4x1xf32>
    %12 = arith.mulf %9, %9 : vector<4x1xf32>
    %13 = arith.subf %11, %12 : vector<4x1xf32>
    %cst_11 = arith.constant 0.000000e+00 : f32
    %14 = vector.broadcast %cst_11 : f32 to vector<4x1xf32>
    %15 = arith.maximumf %13, %14 : vector<4x1xf32>
    %cst_12 = arith.constant 9.99999974E-6 : f32
    %16 = vector.broadcast %cst_12 : f32 to vector<4x1xf32>
    %17 = arith.addf %15, %16 : vector<4x1xf32>
    %18 = math.rsqrt %17 : vector<4x1xf32>
    %c0_13 = arith.constant 0 : index
    %c0_14 = arith.constant 0 : index
    %19 = vector.load %arg4[%c0_13, %c0_14] : memref<4x1xf32, #tpu.memory_space<vmem>>, vector<4x1xf32>
    %20 = arith.mulf %18, %19 : vector<4x1xf32>
    %c0_15 = arith.constant 0 : index
    %c0_16 = arith.constant 0 : index
    %21 = vector.load %arg5[%c0_15, %c0_16] : memref<4x1xf32, #tpu.memory_space<vmem>>, vector<4x1xf32>
    %22 = arith.mulf %9, %20 : vector<4x1xf32>
    %23 = arith.subf %21, %22 : vector<4x1xf32>
    %24 = vector.broadcast %20 : vector<4x1xf32> to vector<4x256xf32>
    %25 = arith.mulf %1, %24 : vector<4x256xf32>
    %26 = vector.broadcast %23 : vector<4x1xf32> to vector<4x256xf32>
    %27 = arith.addf %25, %26 : vector<4x256xf32>
    %cst_17 = arith.constant 0.000000e+00 : f32
    %28 = vector.broadcast %cst_17 : f32 to vector<4x256xf32>
    %29 = arith.maximumf %27, %28 : vector<4x256xf32>
    %c17_i32 = arith.constant 17 : i32
    %30 = tpu.dynamic_rotate %29 by %c17_i32 dim 1 : vector<4x256xf32>, i32 -> vector<4x256xf32>
    %c16_i32 = arith.constant 16 : i32
    %31 = tpu.dynamic_rotate %29 by %c16_i32 dim 1 : vector<4x256xf32>, i32 -> vector<4x256xf32>
    %c15_i32 = arith.constant 15 : i32
    %32 = tpu.dynamic_rotate %29 by %c15_i32 dim 1 : vector<4x256xf32>, i32 -> vector<4x256xf32>
    %c1_i32 = arith.constant 1 : i32
    %33 = tpu.dynamic_rotate %29 by %c1_i32 dim 1 : vector<4x256xf32>, i32 -> vector<4x256xf32>
    %c255_i32 = arith.constant 255 : i32
    %34 = tpu.dynamic_rotate %29 by %c255_i32 dim 1 : vector<4x256xf32>, i32 -> vector<4x256xf32>
    %c241_i32 = arith.constant 241 : i32
    %35 = tpu.dynamic_rotate %29 by %c241_i32 dim 1 : vector<4x256xf32>, i32 -> vector<4x256xf32>
    %c240_i32 = arith.constant 240 : i32
    %36 = tpu.dynamic_rotate %29 by %c240_i32 dim 1 : vector<4x256xf32>, i32 -> vector<4x256xf32>
    %c239_i32 = arith.constant 239 : i32
    %37 = tpu.dynamic_rotate %29 by %c239_i32 dim 1 : vector<4x256xf32>, i32 -> vector<4x256xf32>
    %38 = tpu.concatenate %30, %31, %32, %33, %29, %34, %35, %36, %37 in 0 : vector<4x256xf32>, vector<4x256xf32>, vector<4x256xf32>, vector<4x256xf32>, vector<4x256xf32>, vector<4x256xf32>, vector<4x256xf32>, vector<4x256xf32>, vector<4x256xf32> -> vector<36x256xf32>
    %39 = arith.mulf %38, %2 : vector<36x256xf32>
    %c0_18 = arith.constant 0 : index
    %c0_19 = arith.constant 0 : index
    %40 = vector.load %arg6[%c0_18, %c0_19] : memref<4x36xbf16, #tpu.memory_space<vmem>>, vector<4x36xbf16>
    %41 = arith.truncf %39 : vector<36x256xf32> to vector<36x256xbf16>
    %cst_20 = arith.constant dense<0.000000e+00> : vector<4x256xf32>
    %42 = tpu.matmul %40, %41, %cst_20 {dimension_numbers = #tpu.dot_dimension_numbers<[1], [0], [0], [1], [0, 0, 1, 1], [], []>} : vector<4x36xbf16>, vector<36x256xbf16>, vector<4x256xf32> -> vector<4x256xf32>
    %cst_21 = arith.constant dense<0.000000e+00> : vector<4xf32>
    %43 = vector.multi_reduction <add>, %42, %cst_21 [1] : vector<4x256xf32> to vector<4xf32>
    %44 = vector.shape_cast %43 : vector<4xf32> to vector<4x1xf32>
    %45 = arith.mulf %42, %42 : vector<4x256xf32>
    %cst_22 = arith.constant dense<0.000000e+00> : vector<4xf32>
    %46 = vector.multi_reduction <add>, %45, %cst_22 [1] : vector<4x256xf32> to vector<4xf32>
    %47 = vector.shape_cast %46 : vector<4xf32> to vector<4x1xf32>
    %c0_23 = arith.constant 0 : index
    %c0_24 = arith.constant 0 : index
    %48 = vector.load %arg7[%c0_23, %c0_24] : memref<4x4xf32, #tpu.memory_space<vmem>>, vector<4x4xf32>
    %cst_25 = arith.constant dense<0.000000e+00> : vector<4x1xf32>
    %49 = tpu.matmul %48, %44, %cst_25 {dimension_numbers = #tpu.dot_dimension_numbers<[1], [0], [0], [1], [0, 0, 1, 1], [], []>} : vector<4x4xf32>, vector<4x1xf32>, vector<4x1xf32> -> vector<4x1xf32>
    %c0_26 = arith.constant 0 : index
    %c0_27 = arith.constant 0 : index
    %50 = vector.load %arg7[%c0_26, %c0_27] : memref<4x4xf32, #tpu.memory_space<vmem>>, vector<4x4xf32>
    %cst_28 = arith.constant dense<0.000000e+00> : vector<4x1xf32>
    %51 = tpu.matmul %50, %47, %cst_28 {dimension_numbers = #tpu.dot_dimension_numbers<[1], [0], [0], [1], [0, 0, 1, 1], [], []>} : vector<4x4xf32>, vector<4x1xf32>, vector<4x1xf32> -> vector<4x1xf32>
    %52 = arith.mulf %49, %49 : vector<4x1xf32>
    %53 = arith.subf %51, %52 : vector<4x1xf32>
    %cst_29 = arith.constant 0.000000e+00 : f32
    %54 = vector.broadcast %cst_29 : f32 to vector<4x1xf32>
    %55 = arith.maximumf %53, %54 : vector<4x1xf32>
    %cst_30 = arith.constant 9.99999974E-6 : f32
    %56 = vector.broadcast %cst_30 : f32 to vector<4x1xf32>
    %57 = arith.addf %55, %56 : vector<4x1xf32>
    %58 = math.rsqrt %57 : vector<4x1xf32>
    %c0_31 = arith.constant 0 : index
    %c0_32 = arith.constant 0 : index
    %59 = vector.load %arg8[%c0_31, %c0_32] : memref<4x1xf32, #tpu.memory_space<vmem>>, vector<4x1xf32>
    %60 = arith.mulf %58, %59 : vector<4x1xf32>
    %c0_33 = arith.constant 0 : index
    %c0_34 = arith.constant 0 : index
    %61 = vector.load %arg9[%c0_33, %c0_34] : memref<4x1xf32, #tpu.memory_space<vmem>>, vector<4x1xf32>
    %62 = arith.mulf %49, %60 : vector<4x1xf32>
    %63 = arith.subf %61, %62 : vector<4x1xf32>
    %64 = vector.broadcast %60 : vector<4x1xf32> to vector<4x256xf32>
    %65 = arith.mulf %42, %64 : vector<4x256xf32>
    %66 = vector.broadcast %63 : vector<4x1xf32> to vector<4x256xf32>
    %67 = arith.addf %65, %66 : vector<4x256xf32>
    %cst_35 = arith.constant 0.000000e+00 : f32
    %68 = vector.broadcast %cst_35 : f32 to vector<4x256xf32>
    %69 = arith.maximumf %67, %68 : vector<4x256xf32>
    %c17_i32_36 = arith.constant 17 : i32
    %70 = tpu.dynamic_rotate %69 by %c17_i32_36 dim 1 : vector<4x256xf32>, i32 -> vector<4x256xf32>
    %c16_i32_37 = arith.constant 16 : i32
    %71 = tpu.dynamic_rotate %69 by %c16_i32_37 dim 1 : vector<4x256xf32>, i32 -> vector<4x256xf32>
    %c15_i32_38 = arith.constant 15 : i32
    %72 = tpu.dynamic_rotate %69 by %c15_i32_38 dim 1 : vector<4x256xf32>, i32 -> vector<4x256xf32>
    %c1_i32_39 = arith.constant 1 : i32
    %73 = tpu.dynamic_rotate %69 by %c1_i32_39 dim 1 : vector<4x256xf32>, i32 -> vector<4x256xf32>
    %c255_i32_40 = arith.constant 255 : i32
    %74 = tpu.dynamic_rotate %69 by %c255_i32_40 dim 1 : vector<4x256xf32>, i32 -> vector<4x256xf32>
    %c241_i32_41 = arith.constant 241 : i32
    %75 = tpu.dynamic_rotate %69 by %c241_i32_41 dim 1 : vector<4x256xf32>, i32 -> vector<4x256xf32>
    %c240_i32_42 = arith.constant 240 : i32
    %76 = tpu.dynamic_rotate %69 by %c240_i32_42 dim 1 : vector<4x256xf32>, i32 -> vector<4x256xf32>
    %c239_i32_43 = arith.constant 239 : i32
    %77 = tpu.dynamic_rotate %69 by %c239_i32_43 dim 1 : vector<4x256xf32>, i32 -> vector<4x256xf32>
    %78 = tpu.concatenate %70, %71, %72, %73, %69, %74, %75, %76, %77 in 0 : vector<4x256xf32>, vector<4x256xf32>, vector<4x256xf32>, vector<4x256xf32>, vector<4x256xf32>, vector<4x256xf32>, vector<4x256xf32>, vector<4x256xf32>, vector<4x256xf32> -> vector<36x256xf32>
    %79 = arith.mulf %78, %2 : vector<36x256xf32>
    %c0_44 = arith.constant 0 : index
    %c0_45 = arith.constant 0 : index
    %80 = vector.load %arg10[%c0_44, %c0_45] : memref<4x36xbf16, #tpu.memory_space<vmem>>, vector<4x36xbf16>
    %81 = arith.truncf %79 : vector<36x256xf32> to vector<36x256xbf16>
    %cst_46 = arith.constant dense<0.000000e+00> : vector<4x256xf32>
    %82 = tpu.matmul %80, %81, %cst_46 {dimension_numbers = #tpu.dot_dimension_numbers<[1], [0], [0], [1], [0, 0, 1, 1], [], []>} : vector<4x36xbf16>, vector<36x256xbf16>, vector<4x256xf32> -> vector<4x256xf32>
    %83 = arith.addf %82, %1 : vector<4x256xf32>
    %c0_47 = arith.constant 0 : index
    %c0_48 = arith.constant 0 : index
    %c0_49 = arith.constant 0 : index
    %84 = vector.load %arg11[%c0_47, %c0_48, %c0_49] : memref<1x4x256xf32, #tpu.memory_space<vmem>>, vector<1x4x256xf32>
    %85 = vector.shape_cast %84 : vector<1x4x256xf32> to vector<4x256xf32>
    %86 = vector.shape_cast %83 : vector<4x256xf32> to vector<1x4x256xf32>
    tpu.vector_store %arg11[%c0_47, %c0_48, %c0_49], %86 {strides = array<i32>} : memref<1x4x256xf32, #tpu.memory_space<vmem>>, vector<1x4x256xf32>,
    return
  }
  func.func @transform_0(%arg0: i32) -> (i32, i32, i32) {
    %c0_i32 = arith.constant 0 : i32
    %c0_i32_0 = arith.constant 0 : i32
    %c0_i32_1 = arith.constant 0 : i32
    return %arg0, %c0_i32, %c0_i32_0 : i32, i32, i32
  }
  func.func @transform_1(%arg0: i32) -> (i32, i32) {
    %c0_i32 = arith.constant 0 : i32
    %c0_i32_0 = arith.constant 0 : i32
    %c0_i32_1 = arith.constant 0 : i32
    return %c0_i32, %c0_i32_0 : i32, i32
  }
  func.func @transform_2(%arg0: i32) -> (i32, i32) {
    %c0_i32 = arith.constant 0 : i32
    %c0_i32_0 = arith.constant 0 : i32
    %c0_i32_1 = arith.constant 0 : i32
    return %c0_i32, %c0_i32_0 : i32, i32
  }
  func.func @transform_3(%arg0: i32) -> (i32, i32) {
    %c0_i32 = arith.constant 0 : i32
    %c0_i32_0 = arith.constant 0 : i32
    %c0_i32_1 = arith.constant 0 : i32
    return %c0_i32, %c0_i32_0 : i32, i32
  }
  func.func @transform_4(%arg0: i32) -> (i32, i32) {
    %c0_i32 = arith.constant 0 : i32
    %c0_i32_0 = arith.constant 0 : i32
    %c0_i32_1 = arith.constant 0 : i32
    return %c0_i32, %c0_i32_0 : i32, i32
  }
  func.func @transform_5(%arg0: i32) -> (i32, i32) {
    %c0_i32 = arith.constant 0 : i32
    %c0_i32_0 = arith.constant 0 : i32
    %c0_i32_1 = arith.constant 0 : i32
    return %c0_i32, %c0_i32_0 : i32, i32
  }
  func.func @transform_6(%arg0: i32) -> (i32, i32) {
    %c0_i32 = arith.constant 0 : i32
    %c0_i32_0 = arith.constant 0 : i32
    %c0_i32_1 = arith.constant 0 : i32
    return %c0_i32, %c0_i32_0 : i32, i32
  }
  func.func @transform_7(%arg0: i32) -> (i32, i32) {
    %c0_i32 = arith.constant 0 : i32
    %c0_i32_0 = arith.constant 0 : i32
    %c0_i32_1 = arith.constant 0 : i32
    return %c0_i32, %c0_i32_0 : i32, i32
  }
  func.func @transform_8(%arg0: i32) -> (i32, i32) {
    %c0_i32 = arith.constant 0 : i32
    %c0_i32_0 = arith.constant 0 : i32
    %c0_i32_1 = arith.constant 0 : i32
    return %c0_i32, %c0_i32_0 : i32, i32
  }
  func.func @transform_9(%arg0: i32) -> (i32, i32) {
    %c0_i32 = arith.constant 0 : i32
    %c0_i32_0 = arith.constant 0 : i32
    %c0_i32_1 = arith.constant 0 : i32
    return %c0_i32, %c0_i32_0 : i32, i32
  }
  func.func @transform_10(%arg0: i32) -> (i32, i32, i32) {
    %c0_i32 = arith.constant 0 : i32
    %c0_i32_0 = arith.constant 0 : i32
    %c0_i32_1 = arith.constant 0 : i32
    return %arg0, %c0_i32, %c0_i32_0 : i32, i32, i32
  }
}

</mosaic_0001>

<bundles_post_ra>
// kernel: resblock_pallas.1
= control target key start
LH: loop header
LB: loop body
LE: loop exit
PB: predicated region body
PF: predicated region fallthrough
CT: control target
= control target key end

     0   :  { %s1290_s13 = smov 0   ;;  %s1605_s0 = inlined_call_operand.vmem [shape: f32[2,4,256], index: 0, kind: input, shape index: {}]   ;;  %s1606_s1 = inlined_call_operand.vmem [shape: f32[36,256], index: 1, kind: input, shape index: {}]   ;;  %s1607_s2 = inlined_call_operand.vmem [shape: f32[4,4], index: 2, kind: input, shape index: {}, may-alias: {2,6}]   ;;  %s1608_s3 = inlined_call_operand.vmem [shape: f32[4,1], index: 3, kind: input, shape index: {}]   ;;  %s1609_s4 = inlined_call_operand.vmem [shape: f32[4,1], index: 4, kind: input, shape index: {}]   ;;  %s1610_s5 = inlined_call_operand.vmem [shape: bf16[4,36], index: 5, kind: input, shape index: {}]   ;;  %s1611_s6 = inlined_call_operand.vmem [shape: f32[4,4], index: 6, kind: input, shape index: {}, may-alias: {2,6}]   ;;  %s1612_s7 = inlined_call_operand.vmem [shape: f32[4,1], index: 7, kind: input, shape index: {}]   ;;  %s1613_s8 = inlined_call_operand.vmem [shape: f32[4,1], index: 8, kind: input, shape index: {}]   ;;  %s1614_s9 = inlined_call_operand.vmem [shape: bf16[4,36], index: 9, kind: input, shape index: {}]   ;;  %s1615_s10 = inlined_call_operand.vmem [shape: f32[2,4,256], index: 10, kind: output, shape index: {}]  }
   0x1 LB: > { %s1135_s14 = sadd.s32 4294967295, %s1221_s13   ;;  %p1139_p0 = scmp.ge.s32.totalorder %s1221_s13, 1  ;;  %s1221_s13 = sphi %s1290_s13, %s20_s13  }
   0x2   : > { %p312_p1 = scmp.lt.s32.totalorder %s1221_s13, 3 }
   0x4   : > { %p313_p2 = pnand %p1139_p0, %p312_p1 }
   0x5   : > { %p350_p3 = scmp.lt.s32.totalorder (!%p313_p2), %s1135_s14, 1  ;;  %v1223_v0 = vmov (!%p313_p2), 0.0   ;;  %vm375_vm0 = vcmask (!%p313_p2), 1043456   ;;  %vm1224_vm1 = vmmov (!%p313_p2), 0   ;;  %v390_v11 = vld [vmem:[%s1607_s2] sm:$0xf] (!%p313_p2)  ;;  %v558_v31 = vlaneseq (!%p313_p2) }
   0x6   : > { %316 = sbr.rel (%p313_p2) target bundleno = 1812 (0x714), region = 60  ;;  %1168 = vmatprep.subr.mxu0 (!%p313_p2), %v1223_v0  ;;  %1178 = vmatprep.subr.mxu1 (!%p313_p2), %v1223_v0  ;;  %vm391_vm2 = vcmask (!%p313_p2), 31744   ;;  %v1225_v14 = vmov (!%p313_p2), 0   ;;  %v546_v23 = vld [vmem:[%s1608_s3] sm:$0xf] (!%p313_p2)  ;;  %s1227_s25 = smov (!%p313_p2), 1  }
   0x7   : > { %1170 = vmatprep.mubr.msk.f32.mxu0 (!%p313_p2), %vm1224_vm1, %v1223_v0  ;;  %1180 = vmatprep.mubr.msk.f32.mxu1 (!%p313_p2), %vm1224_vm1, %v1223_v0  ;;  %v548_v26 = vld [vmem:[%s1609_s4] sm:$0xf] (!%p313_p2)  ;;  %v1226_v29 = vmov (!%p313_p2), 839922192   ;;  %v559_v33 = vshrl.u32 (!%p313_p2), %v558_v31, 7  ;;  %s1228_s26 = smov (!%p313_p2), 16  }
   0x8   : > { %1208 = vset.pattern.permute.xlu1 (!%p313_p2), %v1225_v14  ;;  %1209 = vset.pattern.permute.xlu0 (!%p313_p2), %v1225_v14  ;;  %v556_v30 = vunpack.c.l.s4 (!%p313_p2), %v1226_v29  ;;  %s1229_s27 = smov (!%p313_p2), 17   ;;  %s1230_s28 = smov (!%p313_p2), 15   ;;  %v1384_v51 = vand.u32 (!%p313_p2), 127, %v558_v31  ;;  %vm692_vm11 = vcmask (!%p313_p2), 1041408   ;;  %vm688_vm12 = vcmask (!%p313_p2), 293888  }
   0x9   : > { %s1231_s29 = smov (!%p313_p2), 127   ;;  %s1232_s30 = smov (!%p313_p2), 112  }
   0xa   : > { %v557_v32 = vunpack.c.0.s8 (!%p313_p2), %v556_v30  ;;  %s1233_s11 = smov (!%p313_p2), 113   ;;  %s1234_s12 = smov (!%p313_p2), 111   ;;  %vm615_vm3 = vcmp.lt.s32.totalorder (!%p313_p2), %v1384_v51, 127  ;;  %vm594_vm4 = vcmp.lt.s32.totalorder (!%p313_p2), %v1384_v51, 16  ;;  %vm608_vm5 = vcmp.lt.s32.totalorder (!%p313_p2), %v1384_v51, 1 }
   0xb   : > { %vm601_vm6 = vcmp.lt.s32.totalorder (!%p313_p2), %v1384_v51, 15  ;;  %vm629_vm7 = vcmp.lt.s32.totalorder (!%p313_p2), %v1384_v51, 112  ;;  %vm587_vm8 = vcmp.lt.s32.totalorder (!%p313_p2), %v1384_v51, 17  ;;  %vm622_vm9 = vcmp.lt.s32.totalorder (!%p313_p2), %v1384_v51, 113 }
   0xc   : > { %v560_v34 = vsub.s32 (!%p313_p2), %v557_v32, %v559_v33  ;;  %v1457_v32 = vld [vmem:[%s1606_s1 + $0x30] sm:$0xff] (!%p313_p2)  ;;  %v1462_v33 = vld [vmem:[%s1606_s1 + $0x38] sm:$0xff] (!%p313_p2)  ;;  %vm636_vm10 = vcmp.lt.s32.totalorder (!%p313_p2), %v1384_v51, 111  ;;  %v1018_v51 = vld [vmem:[%s1614_s9] sm:$0x3] (!%p313_p2) }
   0xd   : > { %s1617_s14 = smov (!%p350_p3, %s1135_s14), 1 }
   0xe   : > { %s1158_s15 = sshll.u32 %s1617_s14, 3 }
   0xf   : > { %s354_s18 = scalar_lea.vmem %s1605_s0, %s1158_s15 }
  0x10   : > { %v1308_v1 = vld [vmem:[%s354_s18] sm:$0xff] }
  0x11   : > { %v1312_v2 = vcombine.high %v1308_v1, %v1308_v1  ;;  %v376_v3 = vsel %vm375_vm0, %v1308_v1, 0.0  ;;  %v381_v4 = vmul.f32 %v1308_v1, %v1308_v1 }
  0x13   : > { %v377_v5 = vsel %vm375_vm0, %v1312_v2, 0.0  ;;  %v383_v6 = vcombine.high %v381_v4, %v381_v4  ;;  %v385_v7 = vsel %vm375_vm0, %v381_v4, 0.0 }
  0x14   : > { %v378_v8 = vadd.f32 %v377_v5, %v376_v3 }
  0x15   : > { %v386_v9 = vsel %vm375_vm0, %v383_v6, 0.0  ;;  %v1411_v6 = vld [vmem:[%s1606_s1 + $0x10] sm:$0xff] }
  0x16   : > { %379 = vadd.xlane.f32.xlu0 %v378_v8  ;;  %v387_v10 = vadd.f32 %v386_v9, %v385_v7 }
  0x1a   : > { %388 = vadd.xlane.f32.xlu0 %v387_v10 }
  0xa3   : > { %v380_v12 = vpop.xlane.xlu0 %379 }
  0xa4   : > { %1169 = vmatpush3.msk.msra.mxu0 %vm375_vm0, %v380_v12  ;;  %v1423_v12 = vld [vmem:[%s1606_s1 + $0x8] sm:$0xff] }
  0xa5   : > { %1171 = vmatmul.mubr.msk.f32.vlgmr.msra.gmra.mrb[0].mxu0 %vm391_vm2, %v390_v11  ;;  %1173 = vmatprep.subr.mxu0 %v1223_v0 }
  0xa6   : > { %1175 = vmatprep.mubr.msk.f32.mxu0 %vm1224_vm1, %v1223_v0 }
  0xa7   : > { %v389_v13 = vpop.xlane.xlu0 %388 }
  0xa8   : > { %1174 = vmatpush3.msk.msra.mxu0 %vm375_vm0, %v389_v13 }
  0xa9   : > { %1176 = vmatmul.mubr.msk.f32.vlgmr.msra.gmra.mrb[2].mxu0 %vm391_vm2, %v390_v11  ;;  %v1418_v11 = vld [vmem:[%s1606_s1] sm:$0xff] }
  0xaa   : > { %731 = vmatprep.mubr.bf16.mxu0 %v1225_v14 }
 0x178   : > { %v464_v15 = vpop.f32.mrb[0].mxu0 }
 0x179   : > { %v1172_v16 = vpop.f32.mrb[1].mxu0  ;;  %v541_v17 = vmul.f32 %v464_v15, %v464_v15 }
 0x17c   : > { %v537_v18 = vpop.f32.mrb[2].mxu0 }
 0x17d   : > { %v542_v19 = vsub.f32 %v537_v18, %v541_v17  ;;  %v1177_v20 = vpop.f32.mrb[3].mxu0 }
 0x17f   : > { %v543_v21 = vmax.f32 %v542_v19, 0.0 }
 0x181   : > { %v544_v22 = vadd.f32 1e-05, %v543_v21 }
 0x183   : > { %1211 = vrsqrt.f32 %v544_v22 }
 0x18d   : > { %v1212_v24 = vpop.eup %1211 }
 0x18e   : > { %v547_v25 = vmul.f32 %v1212_v24, %v546_v23  ;;  %v1444_v23 = vld [vmem:[%s1606_s1 + $0x20] sm:$0xff] }
 0x190   : > { %553 = vperm.xlu1 %1208, %v547_v25   ;;  %v549_v27 = vmul.f32 %v547_v25, %v464_v15  ;;  %v1428_v15 = vld [vmem:[%s1606_s1 + $0x18] sm:$0xff] }
 0x192   : > { %v550_v28 = vsub.f32 %v548_v26, %v549_v27 }
 0x194   : > { %566 = vperm.xlu1 %1208, %v550_v28  }
 0x20f   : > { %v554_v35 = vpop.permute.xlu1 %553 }
 0x210   : > { %v561_v36 = vrot.slane %v554_v35, %v560_v34  ;;  %v1467_v35 = vld [vmem:[%s1606_s1 + $0x28] sm:$0xff] }
 0x212   : > { %v563_v38 = vmul.f32 %v561_v36, %v1308_v1 }
 0x213   : > { %v567_v37 = vpop.permute.xlu1 %566 }
 0x214   : > { %v574_v39 = vrot.slane %v567_v37, %v560_v34 }
 0x216   : > { %v576_v40 = vadd.f32 %v574_v39, %v563_v38 }
 0x218   : > { %v1346_v41 = vmax.f32 %v576_v40, 0.0 }
 0x21a   : > { %604 = vrot.lane.b32.xlu1 %v1346_v41, %s1227_s25  ;;  %590 = vrot.lane.b32.xlu0 %v1346_v41, %s1228_s26  ;;  %v1354_v42 = vcombine.high %v1346_v41, %v1346_v41 }
 0x21e   : > { %581 = vrot.lane.b32.xlu1 %v1346_v41, %s1229_s27  ;;  %599 = vrot.lane.b32.xlu0 %v1354_v42, %s1230_s28 }
 0x222   : > { %597 = vrot.lane.b32.xlu1 %v1346_v41, %s1230_s28  ;;  %613 = vrot.lane.b32.xlu0 %v1354_v42, %s1231_s29 }
 0x226   : > { %611 = vrot.lane.b32.xlu1 %v1346_v41, %s1231_s29  ;;  %627 = vrot.lane.b32.xlu0 %v1354_v42, %s1232_s30 }
 0x22a   : > { %625 = vrot.lane.b32.xlu1 %v1346_v41, %s1232_s30  ;;  %620 = vrot.lane.b32.xlu0 %v1354_v42, %s1233_s11 }
 0x22e   : > { %634 = vrot.lane.b32.xlu0 %v1354_v42, %s1234_s12  ;;  %592 = vrot.lane.b32.xlu1 %v1354_v42, %s1228_s26 }
 0x232   : > { %606 = vrot.lane.b32.xlu1 %v1354_v42, %s1227_s25 }
 0x236   : > { %583 = vrot.lane.b32.xlu1 %v1354_v42, %s1229_s27 }
 0x23a   : > { %618 = vrot.lane.b32.xlu1 %v1346_v41, %s1233_s11 }
 0x23e   : > { %632 = vrot.lane.b32.xlu1 %v1346_v41, %s1234_s12 }
 0x28c   : > { %v605_v43 = vpop.permute.xlu1 %604  ;;  %v591_v45 = vpop.permute.xlu0 %590 }
 0x290   : > { %v582_v44 = vpop.permute.xlu1 %581  ;;  %v600_v47 = vpop.permute.xlu0 %599 }
 0x294   : > { %v598_v46 = vpop.permute.xlu1 %597  ;;  %v614_v50 = vpop.permute.xlu0 %613 }
 0x295   : > { %v602_v63 = vsel %vm601_vm6, %v598_v46, %v600_v47  ;;  %v603_v3 = vsel %vm601_vm6, %v600_v47, %v598_v46  ;;  %v1487_v46 = vld [vmem:[%s1606_s1 + $0x48] sm:$0xf] }
 0x298   : > { %v612_v48 = vpop.permute.xlu1 %611  ;;  %v628_v55 = vpop.permute.xlu0 %627 }
 0x299   : > { %v616_v53 = vsel %vm615_vm3, %v612_v48, %v614_v50  ;;  %v617_v54 = vsel %vm615_vm3, %v614_v50, %v612_v48 }
 0x29a   : > { %v653_v4 = vrot.slane %v616_v53, 4  ;;  %v654_v5 = vrot.slane %v617_v54, 4 }
 0x29c   : > { %v626_v49 = vpop.permute.xlu1 %625  ;;  %v621_v20 = vpop.permute.xlu0 %620  ;;  %v667_v28 = vsel %vm375_vm0, %v1346_v41, %v653_v4  ;;  %v668_v29 = vsel %vm375_vm0, %v1354_v42, %v654_v5 }
 0x29d   : > { %v630_v16 = vsel %vm629_vm7, %v626_v49, %v628_v55  ;;  %v631_v17 = vsel %vm629_vm7, %v628_v55, %v626_v49  ;;  %v675_v42 = vmul.f32 %v667_v28, %v1444_v23  ;;  %v676_v47 = vmul.f32 %v668_v29, %v1467_v35  ;;  %v907_v29 = vld [vmem:[%s1612_s7] sm:$0xf] }
 0x29e   : > { %v659_v30 = vrot.slane %v630_v16, 4  ;;  %v660_v31 = vrot.slane %v631_v17, 4  ;;  %v752_v17 = vld [vmem:[%s1611_s6] sm:$0xf] }
 0x2a0   : > { %v593_v52 = vpop.permute.xlu1 %592  ;;  %v635_v48 = vpop.permute.xlu0 %634 }
 0x2a1   : > { %v595_v57 = vsel %vm594_vm4, %v591_v45, %v593_v52  ;;  %v596_v58 = vsel %vm594_vm4, %v593_v52, %v591_v45  ;;  %v1482_v45 = vld [vmem:[%s1606_s1 + $0x40] sm:$0xf] }
 0x2a2   : > { %v641_v7 = vrot.slane %v596_v58, 4  ;;  %v642_v8 = vrot.slane %v595_v57, 4 }
 0x2a4   : > { %v607_v56 = vpop.permute.xlu1 %606 }
 0x2a5   : > { %v609_v59 = vsel %vm608_vm5, %v605_v43, %v607_v56  ;;  %v610_v60 = vsel %vm608_vm5, %v607_v56, %v605_v43 }
 0x2a6   : > { %v647_v61 = vrot.slane %v610_v60, 4  ;;  %v648_v62 = vrot.slane %v609_v59, 4  ;;  %v681_v60 = vld [vmem:[%s1610_s5] sm:$0x3] }
 0x2a8   : > { %v665_v9 = vsel %vm375_vm0, %v603_v3, %v647_v61  ;;  %v666_v10 = vsel %vm375_vm0, %v602_v63, %v648_v62  ;;  %v584_v13 = vpop.permute.xlu1 %583 }
 0x2a9   : > { %v588_v18 = vsel %vm587_vm8, %v582_v44, %v584_v13  ;;  %v589_v19 = vsel %vm587_vm8, %v584_v13, %v582_v44  ;;  %v673_v24 = vmul.f32 %v665_v9, %v1411_v6  ;;  %v674_v27 = vmul.f32 %v666_v10, %v1428_v15 }
 0x2aa   : > { %v663_v21 = vsel %vm375_vm0, %v589_v19, %v641_v7  ;;  %v664_v22 = vsel %vm375_vm0, %v588_v18, %v642_v8 }
 0x2ab   : > { %v671_v25 = vmul.f32 %v663_v21, %v1418_v11  ;;  %v672_v26 = vmul.f32 %v664_v22, %v1423_v12 }
 0x2ac   : > { %v619_v34 = vpop.permute.xlu1 %618 }
 0x2ad   : > { %v682_v36 = vpack.c.bf16 %v673_v24, %v671_v25  ;;  %v623_v37 = vsel %vm622_vm9, %v619_v34, %v621_v20  ;;  %v624_v38 = vsel %vm622_vm9, %v621_v20, %v619_v34  ;;  %v683_v39 = vpack.c.bf16 %v674_v27, %v672_v26 }
 0x2ae   : > { %v669_v40 = vsel %vm375_vm0, %v623_v37, %v659_v30  ;;  %v670_v41 = vsel %vm375_vm0, %v624_v38, %v660_v31 }
 0x2af   : > { %v677_v43 = vmul.f32 %v669_v40, %v1457_v32  ;;  %v678_v44 = vmul.f32 %v670_v41, %v1462_v33  ;;  %699 = vmatprep.subr.bf16.mxu0 %v683_v39 }
 0x2b0   : > { %700 = vmatpush1.bf16.msra.mxu0 %v682_v36  ;;  %v633_v49 = vpop.permute.xlu1 %632 }
 0x2b1   : > { %v684_v50 = vpack.c.bf16 %v677_v43, %v675_v42  ;;  %v637_v52 = vsel %vm636_vm10, %v633_v49, %v635_v48  ;;  %v638_v53 = vsel %vm636_vm10, %v635_v48, %v633_v49  ;;  %v685_v54 = vpack.c.bf16 %v678_v44, %v676_v47 }
 0x2b2   : > { %v679_v55 = vmul.f32 %v637_v52, %v1482_v45  ;;  %v680_v56 = vmul.f32 %v638_v53, %v1487_v46 }
 0x2b3   : > { %701 = vmatprep.subr.bf16.mxu0 %v685_v54 }
 0x2b4   : > { %v686_v57 = vpack.c.bf16 %v679_v55, %v679_v55  ;;  %v687_v58 = vpack.c.bf16 %v680_v56, %v680_v56  ;;  %702 = vmatpush1.bf16.msra.mxu0 %v684_v50 }
 0x2b6   : > { %1148 = vmatprep.subr.msk.bf16.mxu0 %vm692_vm11, %v687_v58  ;;  %v694_v59 = vsel %vm692_vm11, %v686_v57, 0 }
 0x2b8   : > { %704 = vmatpush1.bf16.msra.mxu0 %v694_v59 }
 0x2bb   : > { %1149 = vmatmul.mubr.msk.bf16.vlgmr.msra.gmra.mrb[4].mxu0 %vm688_vm12, %v681_v60 }
 0x38e   : > { %v733_v61 = vpop.f32.mrb[4].mxu0 }
 0x38f   : > { %v745_v62 = vmul.f32 %v733_v61, %v733_v61  ;;  %v735_v63 = vpop.f32.mrb[5].mxu0  ;;  %v740_v3 = vsel %vm375_vm0, %v733_v61, 0.0 }
 0x390   : > { %v746_v4 = vmul.f32 %v735_v63, %v735_v63  ;;  %v737_v5 = vpop.f32.mrb[6].mxu0  ;;  %v741_v7 = vsel %vm375_vm0, %v735_v63, 0.0 }
 0x391   : > { %v738_v8 = vpop.f32.mrb[7].mxu0  ;;  %v742_v9 = vadd.f32 %v741_v7, %v740_v3  ;;  %v747_v10 = vsel %vm375_vm0, %v745_v62, 0.0 }
 0x392   : > { %v748_v13 = vsel %vm375_vm0, %v746_v4, 0.0 }
 0x393   : > { %743 = vadd.xlane.f32.xlu1 %v742_v9  ;;  %v749_v16 = vadd.f32 %v748_v13, %v747_v10 }
 0x395   : > { %750 = vadd.xlane.f32.xlu0 %v749_v16 }
 0x420   : > { %v744_v18 = vpop.xlane.xlu1 %743 }
 0x421   : > { %1179 = vmatpush3.msk.msra.mxu1 %vm375_vm0, %v744_v18 }
 0x422   : > { %1181 = vmatmul.mubr.msk.f32.vlgmr.msra.gmra.mrb[0].mxu1 %vm391_vm2, %v752_v17  ;;  %v751_v19 = vpop.xlane.xlu0 %750  ;;  %1183 = vmatprep.subr.mxu1 %v1223_v0 }
 0x423   : > { %1184 = vmatpush3.msk.msra.mxu1 %vm375_vm0, %v751_v19  ;;  %1185 = vmatprep.mubr.msk.f32.mxu1 %vm1224_vm1, %v1223_v0  ;;  %v909_v0 = vld [vmem:[%s1613_s8] sm:$0xf] }
 0x426   : > { %1186 = vmatmul.mubr.msk.f32.vlgmr.msra.gmra.mrb[2].mxu1 %vm391_vm2, %v752_v17 }
 0x427   : > { %1066 = vmatprep.mubr.bf16.mxu1 %v1225_v14 }
 0x4f5   : > { %v825_v20 = vpop.f32.mrb[0].mxu1 }
 0x4f6   : > { %v1182_v21 = vpop.f32.mrb[1].mxu1  ;;  %v902_v22 = vmul.f32 %v825_v20, %v825_v20 }
 0x4f9   : > { %v898_v24 = vpop.f32.mrb[2].mxu1 }
 0x4fa   : > { %v903_v25 = vsub.f32 %v898_v24, %v902_v22  ;;  %v1187_v26 = vpop.f32.mrb[3].mxu1 }
 0x4fc   : > { %v904_v27 = vmax.f32 %v903_v25, 0.0 }
 0x4fe   : > { %v905_v28 = vadd.f32 1e-05, %v904_v27 }
 0x500   : > { %1213 = vrsqrt.f32 %v905_v28 }
 0x50a   : > { %v1214_v30 = vpop.eup %1213 }
 0x50b   : > { %v908_v31 = vmul.f32 %v1214_v30, %v907_v29 }
 0x50d   : > { %914 = vperm.xlu0 %1209, %v908_v31   ;;  %v910_v14 = vmul.f32 %v908_v31, %v825_v20 }
 0x50f   : > { %v911_v34 = vsub.f32 %v909_v0, %v910_v14 }
 0x511   : > { %921 = vperm.xlu1 %1208, %v911_v34  }
 0x58c   : > { %v915_v36 = vpop.permute.xlu0 %914 }
 0x58d   : > { %v917_v37 = vmul.f32 %v915_v36, %v733_v61  ;;  %v918_v39 = vmul.f32 %v915_v36, %v735_v63 }
 0x590   : > { %v922_v38 = vpop.permute.xlu1 %921 }
 0x591   : > { %v924_v40 = vadd.f32 %v922_v38, %v917_v37  ;;  %v925_v41 = vadd.f32 %v922_v38, %v918_v39 }
 0x593   : > { %v926_v42 = vmax.f32 %v924_v40, 0.0  ;;  %v927_v43 = vmax.f32 %v925_v41, 0.0 }
 0x595   : > { %940 = vrot.lane.b32.xlu0 %v926_v42, %s1230_s28  ;;  %934 = vrot.lane.b32.xlu1 %v926_v42, %s1228_s26 }
 0x599   : > { %952 = vrot.lane.b32.xlu0 %v926_v42, %s1231_s29  ;;  %936 = vrot.lane.b32.xlu1 %v927_v43, %s1228_s26 }
 0x59d   : > { %964 = vrot.lane.b32.xlu0 %v926_v42, %s1232_s30  ;;  %946 = vrot.lane.b32.xlu1 %v926_v42, %s1227_s25 }
 0x5a1   : > { %958 = vrot.lane.b32.xlu0 %v926_v42, %s1233_s11  ;;  %948 = vrot.lane.b32.xlu1 %v927_v43, %s1227_s25 }
 0x5a5   : > { %970 = vrot.lane.b32.xlu0 %v926_v42, %s1234_s12  ;;  %928 = vrot.lane.b32.xlu1 %v926_v42, %s1229_s27 }
 0x5a9   : > { %930 = vrot.lane.b32.xlu1 %v927_v43, %s1229_s27 }
 0x5ad   : > { %942 = vrot.lane.b32.xlu1 %v927_v43, %s1230_s28 }
 0x5b1   : > { %954 = vrot.lane.b32.xlu1 %v927_v43, %s1231_s29  ;;  %s359_s29 = scalar_lea.vmem %s1615_s10, %s1158_s15 }
 0x5b5   : > { %966 = vrot.lane.b32.xlu1 %v927_v43, %s1232_s30 }
 0x5b9   : > { %960 = vrot.lane.b32.xlu1 %v927_v43, %s1233_s11 }
 0x5bd   : > { %972 = vrot.lane.b32.xlu1 %v927_v43, %s1234_s12 }
 0x607   : > { %v935_v44 = vpop.permute.xlu1 %934  ;;  %v941_v50 = vpop.permute.xlu0 %940 }
 0x60b   : > { %v937_v47 = vpop.permute.xlu1 %936  ;;  %v953_v60 = vpop.permute.xlu0 %952 }
 0x60c   : > { %v938_v53 = vsel %vm594_vm4, %v935_v44, %v937_v47  ;;  %v939_v54 = vsel %vm594_vm4, %v937_v47, %v935_v44 }
 0x60d   : > { %v978_v61 = vrot.slane %v939_v54, 4  ;;  %v979_v62 = vrot.slane %v938_v53, 4 }
 0x60f   : > { %v947_v48 = vpop.permute.xlu1 %946  ;;  %v965_v20 = vpop.permute.xlu0 %964 }
 0x613   : > { %v949_v49 = vpop.permute.xlu1 %948 }
 0x614   : > { %v950_v56 = vsel %vm608_vm5, %v947_v48, %v949_v49  ;;  %v951_v57 = vsel %vm608_vm5, %v949_v49, %v947_v48 }
 0x615   : > { %v984_v63 = vrot.slane %v951_v57, 4  ;;  %v985_v3 = vrot.slane %v950_v56, 4 }
 0x617   : > { %v929_v52 = vpop.permute.xlu1 %928 }
 0x61b   : > { %v931_v55 = vpop.permute.xlu1 %930 }
 0x61c   : > { %v932_v58 = vsel %vm587_vm8, %v929_v52, %v931_v55  ;;  %v933_v59 = vsel %vm587_vm8, %v931_v55, %v929_v52 }
 0x61d   : > { %v1000_v4 = vsel %vm375_vm0, %v933_v59, %v978_v61  ;;  %v1001_v5 = vsel %vm375_vm0, %v932_v58, %v979_v62 }
 0x61e   : > { %v1008_v16 = vmul.f32 %v1000_v4, %v1418_v11  ;;  %v1009_v17 = vmul.f32 %v1001_v5, %v1423_v12 }
 0x61f   : > { %v943_v7 = vpop.permute.xlu1 %942 }
 0x620   : > { %v944_v8 = vsel %vm601_vm6, %v941_v50, %v943_v7  ;;  %v945_v9 = vsel %vm601_vm6, %v943_v7, %v941_v50 }
 0x621   : > { %v1002_v10 = vsel %vm375_vm0, %v945_v9, %v984_v63  ;;  %v1003_v13 = vsel %vm375_vm0, %v944_v8, %v985_v3 }
 0x622   : > { %v1010_v18 = vmul.f32 %v1002_v10, %v1411_v6  ;;  %v1011_v19 = vmul.f32 %v1003_v13, %v1428_v15  ;;  %v959_v15 = vpop.permute.xlu0 %958 }
 0x623   : > { %v955_v21 = vpop.permute.xlu1 %954 }
 0x624   : > { %v1019_v22 = vpack.c.bf16 %v1010_v18, %v1008_v16  ;;  %v956_v24 = vsel %vm615_vm3, %v953_v60, %v955_v21  ;;  %v957_v25 = vsel %vm615_vm3, %v955_v21, %v953_v60  ;;  %v1020_v26 = vpack.c.bf16 %v1011_v19, %v1009_v17 }
 0x625   : > { %v990_v27 = vrot.slane %v956_v24, 4  ;;  %v991_v28 = vrot.slane %v957_v25, 4 }
 0x626   : > { %1034 = vmatprep.subr.bf16.mxu1 %v1020_v26 }
 0x627   : > { %1035 = vmatpush1.bf16.msra.mxu1 %v1019_v22  ;;  %v967_v11 = vpop.permute.xlu1 %966  ;;  %v1004_v29 = vsel %vm375_vm0, %v926_v42, %v990_v27  ;;  %v1005_v30 = vsel %vm375_vm0, %v927_v43, %v991_v28  ;;  %v971_v43 = vpop.permute.xlu0 %970 }
 0x628   : > { %v968_v6 = vsel %vm629_vm7, %v965_v20, %v967_v11  ;;  %v969_v12 = vsel %vm629_vm7, %v967_v11, %v965_v20  ;;  %v1012_v39 = vmul.f32 %v1004_v29, %v1444_v23  ;;  %v1013_v42 = vmul.f32 %v1005_v30, %v1467_v35 }
 0x629   : > { %v996_v31 = vrot.slane %v968_v6, 4  ;;  %v997_v0 = vrot.slane %v969_v12, 4 }
 0x62b   : > { %v961_v14 = vpop.permute.xlu1 %960 }
 0x62c   : > { %v962_v34 = vsel %vm622_vm9, %v959_v15, %v961_v14  ;;  %v963_v36 = vsel %vm622_vm9, %v961_v14, %v959_v15 }
 0x62d   : > { %v1006_v37 = vsel %vm375_vm0, %v962_v34, %v996_v31  ;;  %v1007_v38 = vsel %vm375_vm0, %v963_v36, %v997_v0 }
 0x62e   : > { %v1014_v40 = vmul.f32 %v1006_v37, %v1457_v32  ;;  %v1015_v41 = vmul.f32 %v1007_v38, %v1462_v33 }
 0x62f   : > { %v973_v44 = vpop.permute.xlu1 %972 }
 0x630   : > { %v1021_v47 = vpack.c.bf16 %v1014_v40, %v1012_v39  ;;  %v974_v48 = vsel %vm636_vm10, %v971_v43, %v973_v44  ;;  %v975_v49 = vsel %vm636_vm10, %v973_v44, %v971_v43  ;;  %v1022_v50 = vpack.c.bf16 %v1015_v41, %v1013_v42 }
 0x631   : > { %v1016_v52 = vmul.f32 %v974_v48, %v1482_v45  ;;  %v1017_v23 = vmul.f32 %v975_v49, %v1487_v46 }
 0x632   : > { %1036 = vmatprep.subr.bf16.mxu1 %v1022_v50 }
 0x633   : > { %v1023_v32 = vpack.c.bf16 %v1016_v52, %v1016_v52  ;;  %v1024_v33 = vpack.c.bf16 %v1017_v23, %v1017_v23  ;;  %1037 = vmatpush1.bf16.msra.mxu1 %v1021_v47 }
 0x635   : > { %1154 = vmatprep.subr.msk.bf16.mxu1 %vm692_vm11, %v1024_v33  ;;  %v1029_v35 = vsel %vm692_vm11, %v1023_v32, 0 }
 0x637   : > { %1039 = vmatpush1.bf16.msra.mxu1 %v1029_v35 }
 0x63a   : > { %1155 = vmatmul.mubr.msk.bf16.vlgmr.msra.gmra.mrb[4].mxu1 %vm688_vm12, %v1018_v51 }
 0x70d   : > { %v1068_v53 = vpop.f32.mrb[4].mxu1 }
 0x70e   : > { %v1069_v45 = vadd.f32 %v1068_v53, %v1308_v1  ;;  %v1070_v54 = vpop.f32.mrb[5].mxu1 }
 0x70f   : > { %v1071_v46 = vadd.f32 %v1070_v54, %v1312_v2  ;;  %v1072_v55 = vpop.f32.mrb[6].mxu1 }
 0x710   : > { %v1073_v56 = vpop.f32.mrb[7].mxu1 }
 0x711   : > { %v1077_v57 = vcombine.low %v1069_v45, %v1071_v46 }
 0x713   : > { %1079 = vst [vmem:[%s359_s29] sm:$0xff] %v1077_v57 }
 0x714 PF: > { %s20_s13 = sadd.s32 1, %s1221_s13  }
 0x715   : > { %p17_p4 = scmp.ge.s32.totalorder %s20_s13, 4  }
 0x717   :  { %19 = sbr.rel (!%p17_p4) target bundleno = 1 (0x1), region = 90 }

</bundles_post_ra>
